<compile_context>
chip_gen: v5e
topology: v5e:2x2
jax: 0.10.0
libtpu: 0.0.40
codegen_flags: <defaults>
</compile_context>

<pallas_src>
import functools

import jax
import jax.numpy as jnp
from jax.experimental import pallas as pl
from jax.experimental.pallas import tpu as pltpu


# ----------------------------------------------------------------------------- helpers
def _gaussian_1d(window_size=11, sigma=1.5):
    xs = jnp.arange(window_size, dtype=jnp.float32) - (window_size // 2)
    g = jnp.exp(-(xs * xs) / (2.0 * sigma * sigma))
    return g / jnp.sum(g)


def _band_matrix(size, g1d):
    """M[i, j] = g1d[i - j + half] for |i - j| <= half else 0 (zero-padded 1D conv)."""
    n = g1d.shape[0]
    half = n // 2
    i = jnp.arange(size)[:, None]
    j = jnp.arange(size)[None, :]
    d = i - j + half
    valid = (d >= 0) & (d < n)
    return jnp.where(valid, g1d[jnp.clip(d, 0, n - 1)], 0.0).astype(jnp.float32)


def _sum_all(x):
    """Full reduction to shape (1, 1), one axis at a time (robust Mosaic lowering)."""
    return jnp.sum(jnp.sum(x, axis=1, keepdims=True), axis=0, keepdims=True)


# ----------------------------------------------------------------------------- kernel
def _loss_kernel(x1_ref, x2_ref, est_ref, kron_ref, o_ref, st_ref, *,
                 bc, w, hw, n_total, count_h, count_w, a_const, c1, c2):
    x1 = x1_ref[...]      # (BC, HW) out_image
    x2 = x2_ref[...]      # (BC, HW) gt_image
    est = est_ref[...]    # (BC, HW) est_noise

    inv_n = 1.0 / n_total

    # ---- Smooth L1 (beta = 1, mean reduction) -----------------------------------
    d = x1 - x2
    ad = jnp.abs(d)
    sl1 = jnp.where(ad < 1.0, 0.5 * d * d, ad - 0.5)
    sl1_mean = _sum_all(sl1) * inv_n                                   # (1, 1)

    # ---- Total variation on est_noise (same normalization as the module) --------
    # Vertical neighbours: lane shift by W (cheap XLU lane rotation on the value).
    dh = est[:, w:] - est[:, : hw - w]
    h_tv = _sum_all(dh * dh)
    # Horizontal neighbours: lane shift by 1, masking out pairs that wrap a row.
    dw = est[:, 1:] - est[:, : hw - 1]
    lane = jax.lax.broadcasted_iota(jnp.int32, dw.shape, 1)
    dw = jnp.where((lane % w) != (w - 1), dw, 0.0)
    w_tv = _sum_all(dw * dw)
    tv = h_tv * (1.0 / count_h) + w_tv * (1.0 / count_w)               # (1, 1)

    # ---- SSIM (11x11 Gaussian window, zero padding, pytorch_ssim semantics) -----
    # All 5 filtered statistics with ONE lane-dense MXU matmul:
    #   (5*BC, HW) @ kron(Bh, Bw)  with K = N = HW = 256.
    st_ref[0 * bc:1 * bc, :] = x1
    st_ref[1 * bc:2 * bc, :] = x2
    st_ref[2 * bc:3 * bc, :] = x1 * x1
    st_ref[3 * bc:4 * bc, :] = x2 * x2
    st_ref[4 * bc:5 * bc, :] = x1 * x2
    filt = jnp.dot(st_ref[...], kron_ref[...],
                   preferred_element_type=jnp.float32)                 # (5*BC, HW)

    mu1 = filt[0 * bc:1 * bc, :]
    mu2 = filt[1 * bc:2 * bc, :]
    e11 = filt[2 * bc:3 * bc, :]
    e22 = filt[3 * bc:4 * bc, :]
    e12 = filt[4 * bc:5 * bc, :]

    mu1_sq = mu1 * mu1
    mu2_sq = mu2 * mu2
    mu12 = mu1 * mu2
    sigma1 = e11 - mu1_sq
    sigma2 = e22 - mu2_sq
    sigma12 = e12 - mu12

    ssim_map = ((2.0 * mu12 + c1) * (2.0 * sigma12 + c2)) / (
        (mu1_sq + mu2_sq + c1) * (sigma1 + sigma2 + c2))
    ssim_mean = _sum_all(ssim_map) * inv_n                             # (1, 1)

    loss = (1.0 - a_const) * sl1_mean + a_const * (1.0 - ssim_mean) + 0.05 * tv
    o_ref[...] = loss.astype(o_ref.dtype)


# ----------------------------------------------------------------------------- wrapper
def fixed_loss_li_forward(out_image, gt_image, est_noise, gt_noise, if_asym,
                          window_size=11, sigma=1.5):
    """Pallas TPU implementation of fixed_loss_li.forward; returns a scalar loss."""
    # gt_noise / if_asym only feed asym_loss, which never reaches the returned loss
    # in the reference PyTorch forward (dead code), so they are not sent to the kernel.
    del gt_noise, if_asym

    b, c, h, w = out_image.shape
    bc, hw = b * c, h * w

    # (B, C, H, W) -> (B*C, H*W): free reshape, lane dim = H*W (multiple of 128 here).
    x1 = out_image.reshape(bc, hw).astype(jnp.float32)
    x2 = gt_image.reshape(bc, hw).astype(jnp.float32)
    est = est_noise.reshape(bc, hw).astype(jnp.float32)

    # Separable 11x11 zero-padded Gaussian filter == one (HW, HW) kron matrix:
    #   row-major-flatten(filt(P)) = row-major-flatten(P) @ kron(Bh, Bw)
    # (both band matrices are symmetric). Constant-folded by XLA; fed once to VMEM.
    g1d = _gaussian_1d(window_size, sigma)
    kron = jnp.kron(_band_matrix(h, g1d), _band_matrix(w, g1d))        # (HW, HW)

    kernel = functools.partial(
        _loss_kernel,
        bc=bc, w=w, hw=hw,
        n_total=float(b * c * h * w),
        count_h=float(c * (h - 1) * w),
        count_w=float(c * h * (w - 1)),
        a_const=0.35, c1=0.01 ** 2, c2=0.03 ** 2)

    out = pl.pallas_call(
        kernel,
        out_shape=jax.ShapeDtypeStruct((1, 1), jnp.float32),
        grid_spec=pltpu.PrefetchScalarGridSpec(
            num_scalar_prefetch=0,
            grid=(1,),                                # whole batch in one step
            in_specs=[
                pl.BlockSpec((bc, hw), lambda i: (0, 0)),
                pl.BlockSpec((bc, hw), lambda i: (0, 0)),
                pl.BlockSpec((bc, hw), lambda i: (0, 0)),
                pl.BlockSpec((hw, hw), lambda i: (0, 0)),
            ],
            out_specs=pl.BlockSpec((1, 1), lambda i: (0, 0)),
            scratch_shapes=[pltpu.VMEM((5 * bc, hw), jnp.float32)],
        ),
        compiler_params=pltpu.CompilerParams(
            dimension_semantics=("arbitrary",)),
    )(x1, x2, est, kron)

    return out[0, 0]


# ----------------------------------------------------------------------------- reference
def _ref_ssim(img1, img2, window_size=11, sigma=1.5):
    _, c, _, _ = img1.shape
    half = window_size // 2
    g = _gaussian_1d(window_size, sigma)
    w2d = jnp.outer(g, g)
    weight = jnp.broadcast_to(w2d, (c, 1, window_size, window_size)).astype(jnp.float32)

    def filt(x):
        return jax.lax.conv_general_dilated(
            x, weight, window_strides=(1, 1),
            padding=((half, half), (half, half)),
            dimension_numbers=("NCHW", "OIHW", "NCHW"),
            feature_group_count=c,
            precision=jax.lax.Precision.HIGHEST)

    mu1, mu2 = filt(img1), filt(img2)
    mu1_sq, mu2_sq, mu12 = mu1 * mu1, mu2 * mu2, mu1 * mu2
    s1 = filt(img1 * img1) - mu1_sq
    s2 = filt(img2 * img2) - mu2_sq
    s12 = filt(img1 * img2) - mu12
    c1, c2 = 0.01 ** 2, 0.03 ** 2
    ssim_map = ((2 * mu12 + c1) * (2 * s12 + c2)) / ((mu1_sq + mu2_sq + c1) * (s1 + s2 + c2))
    return jnp.mean(ssim_map)


def _ref_loss(out_image, gt_image, est_noise, gt_noise, if_asym):
    a = 0.35
    d = out_image - gt_image
    ad = jnp.abs(d)
    smooth_l1 = jnp.mean(jnp.where(ad < 1.0, 0.5 * d * d, ad - 0.5))
    h_x, w_x = est_noise.shape[2], est_noise.shape[3]
    count_h = est_noise.shape[1] * (h_x - 1) * w_x
    count_w = est_noise.shape[1] * h_x * (w_x - 1)
    h_tv = jnp.sum((est_noise[:, :, 1:, :] - est_noise[:, :, :h_x - 1, :]) ** 2)
    w_tv = jnp.sum((est_noise[:, :, :, 1:] - est_noise[:, :, :, :w_x - 1]) ** 2)
    tvloss = h_tv / count_h + w_tv / count_w
    ssim_val = _ref_ssim(out_image, gt_image)
    # asym_loss is computed in the PyTorch forward but never added to `loss`.
    return (1 - a) * smooth_l1 + a * (1 - ssim_val) + 0.05 * tvloss


# ----------------------------------------------------------------------------- main
if __name__ == "__main__":
    B, C, H, W = 2, 4, 16, 16

    key = jax.random.PRNGKey(0)
    k1, k2, k3, k4, k5 = jax.random.split(key, 5)
    out_image = jax.random.normal(k1, (B, C, H, W), dtype=jnp.float32)
    gt_image = out_image + 0.1 * jax.random.normal(k2, (B, C, H, W), dtype=jnp.float32)
    est_noise = 0.1 * jax.random.normal(k3, (B, C, H, W), dtype=jnp.float32)
    gt_noise = 0.1 * jax.random.normal(k4, (B, C, H, W), dtype=jnp.float32)
    if_asym = (jax.random.uniform(k5, (B, C, H, W)) > 0.5).astype(jnp.float32)

    loss = fixed_loss_li_forward(out_image, gt_image, est_noise, gt_noise, if_asym)
    loss = jax.block_until_ready(loss)

    ref = _ref_loss(out_image, gt_image, est_noise, gt_noise, if_asym)

    assert loss.shape == ()
    assert jnp.allclose(loss, ref, atol=5e-3, rtol=5e-3), (float(loss), float(ref))

    print("KERNEL_OK")
</pallas_src>

<mosaic_0001>
module attributes {stable_mosaic.version = 11 : i64} {
  func.func @_loss_kernel(%arg0: i32, %arg1: memref<8x256xf32, #tpu.memory_space<vmem>>, %arg2: memref<8x256xf32, #tpu.memory_space<vmem>>, %arg3: memref<8x256xf32, #tpu.memory_space<vmem>>, %arg4: memref<256x256xf32, #tpu.memory_space<vmem>>, %arg5: memref<1x1xf32, #tpu.memory_space<vmem>>, %arg6: memref<40x256xf32, #tpu.memory_space<vmem>>) attributes {dimension_semantics = [#tpu.dimension_semantics<arbitrary>], iteration_bounds = array<i64: 1>, scalar_prefetch = 0 : i64, scratch_operands = 1 : i64, tpu.core_type = #tpu.core_type<tc>, window_params = [{pipeline_mode = #tpu.pipeline_mode<synchronous>, transform_indices = @transform_0, window_bounds = array<i64: 8, 256>}, {pipeline_mode = #tpu.pipeline_mode<synchronous>, transform_indices = @transform_1, window_bounds = array<i64: 8, 256>}, {pipeline_mode = #tpu.pipeline_mode<synchronous>, transform_indices = @transform_2, window_bounds = array<i64: 8, 256>}, {pipeline_mode = #tpu.pipeline_mode<synchronous>, transform_indices = @transform_3, window_bounds = array<i64: 256, 256>}, {pipeline_mode = #tpu.pipeline_mode<synchronous>, transform_indices = @transform_4, window_bounds = array<i64: 1, 1>}]} {
    %c0 = arith.constant 0 : index
    %c0_0 = arith.constant 0 : index
    %0 = vector.load %arg1[%c0, %c0_0] : memref<8x256xf32, #tpu.memory_space<vmem>>, vector<8x256xf32>
    %c0_1 = arith.constant 0 : index
    %c0_2 = arith.constant 0 : index
    %1 = vector.load %arg2[%c0_1, %c0_2] : memref<8x256xf32, #tpu.memory_space<vmem>>, vector<8x256xf32>
    %c0_3 = arith.constant 0 : index
    %c0_4 = arith.constant 0 : index
    %2 = vector.load %arg3[%c0_3, %c0_4] : memref<8x256xf32, #tpu.memory_space<vmem>>, vector<8x256xf32>
    %3 = arith.subf %0, %1 : vector<8x256xf32>
    %4 = math.absf %3 : vector<8x256xf32>
    %cst = arith.constant 1.000000e+00 : f32
    %5 = vector.broadcast %cst : f32 to vector<8x256xf32>
    %6 = arith.cmpf olt, %4, %5 : vector<8x256xf32>
    %cst_5 = arith.constant 5.000000e-01 : f32
    %7 = vector.broadcast %cst_5 : f32 to vector<8x256xf32>
    %8 = arith.mulf %7, %3 : vector<8x256xf32>
    %9 = arith.mulf %8, %3 : vector<8x256xf32>
    %cst_6 = arith.constant 5.000000e-01 : f32
    %10 = vector.broadcast %cst_6 : f32 to vector<8x256xf32>
    %11 = arith.subf %4, %10 : vector<8x256xf32>
    %12 = arith.select %6, %9, %11 : vector<8x256xi1>, vector<8x256xf32>
    %cst_7 = arith.constant dense<0.000000e+00> : vector<8xf32>
    %13 = vector.multi_reduction <add>, %12, %cst_7 [1] : vector<8x256xf32> to vector<8xf32>
    %14 = vector.shape_cast %13 : vector<8xf32> to vector<8x1xf32>
    %cst_8 = arith.constant dense<0.000000e+00> : vector<1xf32>
    %15 = vector.multi_reduction <add>, %14, %cst_8 [0] : vector<8x1xf32> to vector<1xf32>
    %16 = vector.shape_cast %15 : vector<1xf32> to vector<1x1xf32>
    %cst_9 = arith.constant 4.8828125E-4 : f32
    %17 = vector.broadcast %cst_9 : f32 to vector<1x1xf32>
    %18 = arith.mulf %16, %17 : vector<1x1xf32>
    %19 = vector.extract_strided_slice %2 {offsets = [0, 16], sizes = [8, 240], strides = [1, 1]} : vector<8x256xf32> to vector<8x240xf32>
    %20 = vector.extract_strided_slice %2 {offsets = [0, 0], sizes = [8, 240], strides = [1, 1]} : vector<8x256xf32> to vector<8x240xf32>
    %21 = arith.subf %19, %20 : vector<8x240xf32>
    %22 = arith.mulf %21, %21 : vector<8x240xf32>
    %cst_10 = arith.constant dense<0.000000e+00> : vector<8xf32>
    %23 = vector.multi_reduction <add>, %22, %cst_10 [1] : vector<8x240xf32> to vector<8xf32>
    %24 = vector.shape_cast %23 : vector<8xf32> to vector<8x1xf32>
    %cst_11 = arith.constant dense<0.000000e+00> : vector<1xf32>
    %25 = vector.multi_reduction <add>, %24, %cst_11 [0] : vector<8x1xf32> to vector<1xf32>
    %26 = vector.shape_cast %25 : vector<1xf32> to vector<1x1xf32>
    %27 = vector.extract_strided_slice %2 {offsets = [0, 1], sizes = [8, 255], strides = [1, 1]} : vector<8x256xf32> to vector<8x255xf32>
    %28 = vector.extract_strided_slice %2 {offsets = [0, 0], sizes = [8, 255], strides = [1, 1]} : vector<8x256xf32> to vector<8x255xf32>
    %29 = arith.subf %27, %28 : vector<8x255xf32>
    %30 = tpu.iota {dimensions = array<i32: 1>} : vector<8x255xi32>
    %c16_i32 = arith.constant 16 : i32
    %c0_i32 = arith.constant 0 : i32
    %31 = arith.cmpi eq, %c16_i32, %c0_i32 : i32
    %c1_i32 = arith.constant 1 : i32
    %32 = arith.select %31, %c1_i32, %c16_i32 : i32
    %33 = vector.broadcast %32 : i32 to vector<8x255xi32>
    %34 = arith.remsi %30, %33 : vector<8x255xi32>
    %c0_i32_12 = arith.constant 0 : i32
    %35 = vector.broadcast %c0_i32_12 : i32 to vector<8x255xi32>
    %36 = arith.cmpi ne, %34, %35 : vector<8x255xi32>
    %c0_i32_13 = arith.constant 0 : i32
    %37 = vector.broadcast %c0_i32_13 : i32 to vector<8x255xi32>
    %38 = arith.cmpi slt, %34, %37 : vector<8x255xi32>
    %c0_i32_14 = arith.constant 0 : i32
    %39 = arith.cmpi slt, %32, %c0_i32_14 : i32
    %40 = vector.broadcast %39 : i1 to vector<8x255xi1>
    %41 = vector.broadcast %40 : vector<8x255xi1> to vector<8x255xi1>
    %42 = arith.xori %38, %41 : vector<8x255xi1>
    %43 = arith.andi %42, %36 : vector<8x255xi1>
    %44 = vector.broadcast %32 : i32 to vector<8x255xi32>
    %45 = arith.addi %34, %44 : vector<8x255xi32>
    %46 = arith.select %43, %45, %34 : vector<8x255xi1>, vector<8x255xi32>
    %c15_i32 = arith.constant 15 : i32
    %47 = vector.broadcast %c15_i32 : i32 to vector<8x255xi32>
    %48 = arith.cmpi ne, %46, %47 : vector<8x255xi32>
    %cst_15 = arith.constant 0.000000e+00 : f32
    %49 = vector.broadcast %cst_15 : f32 to vector<8x255xf32>
    %50 = arith.select %48, %29, %49 : vector<8x255xi1>, vector<8x255xf32>
    %51 = arith.mulf %50, %50 : vector<8x255xf32>
    %cst_16 = arith.constant dense<0.000000e+00> : vector<8xf32>
    %52 = vector.multi_reduction <add>, %51, %cst_16 [1] : vector<8x255xf32> to vector<8xf32>
    %53 = vector.shape_cast %52 : vector<8xf32> to vector<8x1xf32>
    %cst_17 = arith.constant dense<0.000000e+00> : vector<1xf32>
    %54 = vector.multi_reduction <add>, %53, %cst_17 [0] : vector<8x1xf32> to vector<1xf32>
    %55 = vector.shape_cast %54 : vector<1xf32> to vector<1x1xf32>
    %cst_18 = arith.constant 0.00104166672 : f32
    %56 = vector.broadcast %cst_18 : f32 to vector<1x1xf32>
    %57 = arith.mulf %26, %56 : vector<1x1xf32>
    %cst_19 = arith.constant 0.00104166672 : f32
    %58 = vector.broadcast %cst_19 : f32 to vector<1x1xf32>
    %59 = arith.mulf %55, %58 : vector<1x1xf32>
    %60 = arith.addf %57, %59 : vector<1x1xf32>
    %c0_20 = arith.constant 0 : index
    %c0_21 = arith.constant 0 : index
    %61 = vector.load %arg6[%c0_20, %c0_21] : memref<40x256xf32, #tpu.memory_space<vmem>>, vector<8x256xf32>
    tpu.vector_store %arg6[%c0_20, %c0_21], %0 {strides = array<i32>} : memref<40x256xf32, #tpu.memory_space<vmem>>, vector<8x256xf32>,
    %c8 = arith.constant 8 : index
    %c0_22 = arith.constant 0 : index
    %62 = vector.load %arg6[%c8, %c0_22] : memref<40x256xf32, #tpu.memory_space<vmem>>, vector<8x256xf32>
    tpu.vector_store %arg6[%c8, %c0_22], %1 {strides = array<i32>} : memref<40x256xf32, #tpu.memory_space<vmem>>, vector<8x256xf32>,
    %63 = arith.mulf %0, %0 : vector<8x256xf32>
    %c16 = arith.constant 16 : index
    %c0_23 = arith.constant 0 : index
    %64 = vector.load %arg6[%c16, %c0_23] : memref<40x256xf32, #tpu.memory_space<vmem>>, vector<8x256xf32>
    tpu.vector_store %arg6[%c16, %c0_23], %63 {strides = array<i32>} : memref<40x256xf32, #tpu.memory_space<vmem>>, vector<8x256xf32>,
    %65 = arith.mulf %1, %1 : vector<8x256xf32>
    %c24 = arith.constant 24 : index
    %c0_24 = arith.constant 0 : index
    %66 = vector.load %arg6[%c24, %c0_24] : memref<40x256xf32, #tpu.memory_space<vmem>>, vector<8x256xf32>
    tpu.vector_store %arg6[%c24, %c0_24], %65 {strides = array<i32>} : memref<40x256xf32, #tpu.memory_space<vmem>>, vector<8x256xf32>,
    %67 = arith.mulf %0, %1 : vector<8x256xf32>
    %c32 = arith.constant 32 : index
    %c0_25 = arith.constant 0 : index
    %68 = vector.load %arg6[%c32, %c0_25] : memref<40x256xf32, #tpu.memory_space<vmem>>, vector<8x256xf32>
    tpu.vector_store %arg6[%c32, %c0_25], %67 {strides = array<i32>} : memref<40x256xf32, #tpu.memory_space<vmem>>, vector<8x256xf32>,
    %c0_26 = arith.constant 0 : index
    %c0_27 = arith.constant 0 : index
    %69 = vector.load %arg6[%c0_26, %c0_27] : memref<40x256xf32, #tpu.memory_space<vmem>>, vector<40x256xf32>
    %c0_28 = arith.constant 0 : index
    %c0_29 = arith.constant 0 : index
    %70 = vector.load %arg4[%c0_28, %c0_29] : memref<256x256xf32, #tpu.memory_space<vmem>>, vector<256x256xf32>
    %cst_30 = arith.constant dense<0.000000e+00> : vector<40x256xf32>
    %71 = tpu.matmul %69, %70, %cst_30 {dimension_numbers = #tpu.dot_dimension_numbers<[1], [0], [0], [1], [0, 0, 1, 1], [], []>} : vector<40x256xf32>, vector<256x256xf32>, vector<40x256xf32> -> vector<40x256xf32>
    %72 = vector.extract_strided_slice %71 {offsets = [0, 0], sizes = [8, 256], strides = [1, 1]} : vector<40x256xf32> to vector<8x256xf32>
    %73 = vector.extract_strided_slice %71 {offsets = [8, 0], sizes = [8, 256], strides = [1, 1]} : vector<40x256xf32> to vector<8x256xf32>
    %74 = vector.extract_strided_slice %71 {offsets = [16, 0], sizes = [8, 256], strides = [1, 1]} : vector<40x256xf32> to vector<8x256xf32>
    %75 = vector.extract_strided_slice %71 {offsets = [24, 0], sizes = [8, 256], strides = [1, 1]} : vector<40x256xf32> to vector<8x256xf32>
    %76 = vector.extract_strided_slice %71 {offsets = [32, 0], sizes = [8, 256], strides = [1, 1]} : vector<40x256xf32> to vector<8x256xf32>
    %77 = arith.mulf %72, %72 : vector<8x256xf32>
    %78 = arith.mulf %73, %73 : vector<8x256xf32>
    %79 = arith.mulf %72, %73 : vector<8x256xf32>
    %80 = arith.subf %74, %77 : vector<8x256xf32>
    %81 = arith.subf %75, %78 : vector<8x256xf32>
    %82 = arith.subf %76, %79 : vector<8x256xf32>
    %cst_31 = arith.constant 2.000000e+00 : f32
    %83 = vector.broadcast %cst_31 : f32 to vector<8x256xf32>
    %84 = arith.mulf %83, %79 : vector<8x256xf32>
    %cst_32 = arith.constant 9.99999974E-5 : f32
    %85 = vector.broadcast %cst_32 : f32 to vector<8x256xf32>
    %86 = arith.addf %84, %85 : vector<8x256xf32>
    %cst_33 = arith.constant 2.000000e+00 : f32
    %87 = vector.broadcast %cst_33 : f32 to vector<8x256xf32>
    %88 = arith.mulf %87, %82 : vector<8x256xf32>
    %cst_34 = arith.constant 8.99999984E-4 : f32
    %89 = vector.broadcast %cst_34 : f32 to vector<8x256xf32>
    %90 = arith.addf %88, %89 : vector<8x256xf32>
    %91 = arith.mulf %86, %90 : vector<8x256xf32>
    %92 = arith.addf %77, %78 : vector<8x256xf32>
    %cst_35 = arith.constant 9.99999974E-5 : f32
    %93 = vector.broadcast %cst_35 : f32 to vector<8x256xf32>
    %94 = arith.addf %92, %93 : vector<8x256xf32>
    %95 = arith.addf %80, %81 : vector<8x256xf32>
    %cst_36 = arith.constant 8.99999984E-4 : f32
    %96 = vector.broadcast %cst_36 : f32 to vector<8x256xf32>
    %97 = arith.addf %95, %96 : vector<8x256xf32>
    %98 = arith.mulf %94, %97 : vector<8x256xf32>
    %99 = arith.divf %91, %98 : vector<8x256xf32>
    %cst_37 = arith.constant dense<0.000000e+00> : vector<8xf32>
    %100 = vector.multi_reduction <add>, %99, %cst_37 [1] : vector<8x256xf32> to vector<8xf32>
    %101 = vector.shape_cast %100 : vector<8xf32> to vector<8x1xf32>
    %cst_38 = arith.constant dense<0.000000e+00> : vector<1xf32>
    %102 = vector.multi_reduction <add>, %101, %cst_38 [0] : vector<8x1xf32> to vector<1xf32>
    %103 = vector.shape_cast %102 : vector<1xf32> to vector<1x1xf32>
    %cst_39 = arith.constant 4.8828125E-4 : f32
    %104 = vector.broadcast %cst_39 : f32 to vector<1x1xf32>
    %105 = arith.mulf %103, %104 : vector<1x1xf32>
    %cst_40 = arith.constant 6.500000e-01 : f32
    %106 = vector.broadcast %cst_40 : f32 to vector<1x1xf32>
    %107 = arith.mulf %106, %18 : vector<1x1xf32>
    %cst_41 = arith.constant 1.000000e+00 : f32
    %108 = vector.broadcast %cst_41 : f32 to vector<1x1xf32>
    %109 = arith.subf %108, %105 : vector<1x1xf32>
    %cst_42 = arith.constant 3.500000e-01 : f32
    %110 = vector.broadcast %cst_42 : f32 to vector<1x1xf32>
    %111 = arith.mulf %110, %109 : vector<1x1xf32>
    %112 = arith.addf %107, %111 : vector<1x1xf32>
    %cst_43 = arith.constant 5.000000e-02 : f32
    %113 = vector.broadcast %cst_43 : f32 to vector<1x1xf32>
    %114 = arith.mulf %113, %60 : vector<1x1xf32>
    %115 = arith.addf %112, %114 : vector<1x1xf32>
    %c0_44 = arith.constant 0 : index
    %c0_45 = arith.constant 0 : index
    %116 = vector.load %arg5[%c0_44, %c0_45] : memref<1x1xf32, #tpu.memory_space<vmem>>, vector<1x1xf32>
    tpu.vector_store %arg5[%c0_44, %c0_45], %115 {strides = array<i32>} : memref<1x1xf32, #tpu.memory_space<vmem>>, vector<1x1xf32>,
    return
  }
  func.func @transform_0(%arg0: i32) -> (i32, i32) {
    %c0_i32 = arith.constant 0 : i32
    %c0_i32_0 = arith.constant 0 : i32
    %c0_i32_1 = arith.constant 0 : i32
    return %c0_i32, %c0_i32_0 : i32, i32
  }
  func.func @transform_1(%arg0: i32) -> (i32, i32) {
    %c0_i32 = arith.constant 0 : i32
    %c0_i32_0 = arith.constant 0 : i32
    %c0_i32_1 = arith.constant 0 : i32
    return %c0_i32, %c0_i32_0 : i32, i32
  }
  func.func @transform_2(%arg0: i32) -> (i32, i32) {
    %c0_i32 = arith.constant 0 : i32
    %c0_i32_0 = arith.constant 0 : i32
    %c0_i32_1 = arith.constant 0 : i32
    return %c0_i32, %c0_i32_0 : i32, i32
  }
  func.func @transform_3(%arg0: i32) -> (i32, i32) {
    %c0_i32 = arith.constant 0 : i32
    %c0_i32_0 = arith.constant 0 : i32
    %c0_i32_1 = arith.constant 0 : i32
    return %c0_i32, %c0_i32_0 : i32, i32
  }
  func.func @transform_4(%arg0: i32) -> (i32, i32) {
    %c0_i32 = arith.constant 0 : i32
    %c0_i32_0 = arith.constant 0 : i32
    %c0_i32_1 = arith.constant 0 : i32
    return %c0_i32, %c0_i32_0 : i32, i32
  }
}

</mosaic_0001>

<bundles_post_ra>
// kernel: tpu_custom_call.1
= control target key start
LH: loop header
LB: loop body
LE: loop exit
PB: predicated region body
PF: predicated region fallthrough
CT: control target
= control target key end

     0   :  { %9 = vsyncpa [#allocation4], 0  ;;  %s765_s0 = inlined_call_operand.hbm [shape: f32[8,256], index: 0, kind: input, shape index: {}]   ;;  %s766_s1 = inlined_call_operand.hbm [shape: f32[8,256], index: 1, kind: input, shape index: {}]   ;;  %s767_s2 = inlined_call_operand.hbm [shape: f32[8,256], index: 2, kind: input, shape index: {}]   ;;  %s768_s3 = inlined_call_operand.hbm [shape: f32[256,256], index: 3, kind: input, shape index: {}]   ;;  %s769_s4 = inlined_call_operand.hbm [shape: f32[1,1], index: 4, kind: output, shape index: {}]  }
   0x1   :  { %10 = vsyncpa [#allocation7], 0 }
   0x2   :  { %11 = vsyncpa [#allocation10], 0  ;;  %s29_s17 = sshll.u32 %s766_s1, 4  ;;  %s30_s17 = int_to_ptr.hbm [resolvable:$true] %s29_s17 }
   0x3   :  { %12 = vsyncpa [#allocation5], 0  ;;  %s666_s18 = smov [#allocation6]   ;;  %s18_s22 = sshll.u32 %s765_s0, 4  ;;  %s19_s22 = int_to_ptr.hbm [resolvable:$true] %s18_s22 }
   0x4   :  { %s31_s19 = sshll.u32 %s666_s18, 4  ;;  %s667_s23 = smov [#allocation3]   ;;  %s32_s19 = int_to_ptr.vmem [resolvable:$true] %s31_s19 }
   0x5   :  { %34 = dma.hbm_to_vmem [thread:$0]  %s30_s17, 256, %s32_s19, [#allocation7]  }
   0x6   :  { %s20_s24 = sshll.u32 %s667_s23, 4  ;;  %s40_s27 = sshll.u32 %s767_s2, 4  ;;  %s21_s24 = int_to_ptr.vmem [resolvable:$true] %s20_s24  ;;  %s41_s27 = int_to_ptr.hbm [resolvable:$true] %s40_s27 }
   0x7   :  { %23 = dma.hbm_to_vmem [thread:$0]  %s19_s22, 256, %s21_s24, [#allocation4]  }
   0x8   :  { %s50_s29 = sshll.u32 %s768_s3, 4  ;;  %s668_s30 = smov [#allocation8]   ;;  %s51_s29 = int_to_ptr.hbm [resolvable:$true] %s50_s29 }
   0x9   :  { %s42_s5 = sshll.u32 %s668_s30, 4  ;;  %s669_s0 = smov [#allocation9]   ;;  %s43_s5 = int_to_ptr.vmem [resolvable:$true] %s42_s5 }
   0xa   :  { %45 = dma.hbm_to_vmem [thread:$0]  %s41_s27, 256, %s43_s5, [#allocation7]  }
   0xb   :  { %s52_s6 = sshll.u32 %s669_s0, 4  ;;  %s670_s7 = smov 256   ;;  %s53_s6 = int_to_ptr.vmem [resolvable:$true] %s52_s6 }
   0xc   :  { %s671_s8 = smov 16  }
   0xd   :  { %58 = dma.hbm_to_vmem [thread:$0]  %s51_s29, 8192, %s53_s6, [#allocation10], %s670_s7, %s670_s7, %s671_s8  }
   0xe   :  { %658 = dma.done.wait [#allocation4], 256  }
   0xf   :  { %659 = vsyncadd [#allocation4], 4294967040 }
  0x10   :  { %660 = dma.done.wait [#allocation7], 512  }
  0x11   :  { %661 = vsyncadd [#allocation7], 4294966784 }
  0x12   :  { %662 = dma.done.wait [#allocation10], 8192  }
  0x13   :  { %663 = vsyncadd [#allocation10], 4294959104  ;;  %v261_v0 = vld [vmem:[#allocation9 + $0xf0] sm:$0xff]  ;;  %v262_v2 = vld [vmem:[#allocation9 + $0xf8] sm:$0xff]  ;;  %s672_s2 = smov 1   ;;  %s673_s3 = smov 112  }
  0x14   :  { %v293_v1 = vld [vmem:[#allocation9 + $0x1f0] sm:$0xff]  ;;  %295 = vmatpush.msra.mxu0 %v261_v0  ;;  %v294_v3 = vld [vmem:[#allocation9 + $0x1f8] sm:$0xff]  ;;  %v259_v5 = vld [vmem:[#allocation9 + $0xe0] sm:$0xff]  ;;  %359 = vmatpush.msra.mxu2 %v262_v2  ;;  %vm111_vm0 = vcmask 130048   ;;  %s674_s9 = smov 127   ;;  %vm143_vm1 = vcmask 7168  }
  0x15   :  { %327 = vmatpush.msra.mxu1 %v293_v1  ;;  %v714_v4 = vld [vmem:[#allocation8] sm:$0xff]  ;;  %391 = vmatpush.msra.mxu3 %v294_v3  ;;  %v291_v6 = vld [vmem:[#allocation9 + $0x1e0] sm:$0xff]  ;;  %v260_v7 = vld [vmem:[#allocation9 + $0xe8] sm:$0xff]  ;;  %vm184_vm13 = vcmask 1039360   ;;  %vm125_vm15 = vcmask 916480   ;;  %s675_s10 = smov [#allocation11]  }
  0x16   :  { %v292_v8 = vld [vmem:[#allocation9 + $0x1e8] sm:$0xff]  ;;  %107 = vrot.lane.b32.xlu1 %v714_v4, %s671_s8  ;;  %296 = vmatpush.msra.mxu0 %v259_v5  ;;  %v257_v9 = vld [vmem:[#allocation9 + $0xd0] sm:$0xff]  ;;  %v258_v11 = vld [vmem:[#allocation9 + $0xd8] sm:$0xff]  ;;  %s508_s11 = sshll.u32 %s675_s10, 4  ;;  %s510_s14 = sshll.u32 %s769_s4, 4  ;;  %s509_s11 = int_to_ptr.vmem [resolvable:$true] %s508_s11  ;;  %s511_s14 = int_to_ptr.hbm [resolvable:$true] %s510_s14 }
  0x17   :  { %v289_v10 = vld [vmem:[#allocation9 + $0x1d0] sm:$0xff]  ;;  %328 = vmatpush.msra.mxu1 %v291_v6  ;;  %360 = vmatpush.msra.mxu2 %v260_v7  ;;  %v290_v12 = vld [vmem:[#allocation9 + $0x1d8] sm:$0xff]  ;;  %v255_v13 = vld [vmem:[#allocation9 + $0xc0] sm:$0xff] }
  0x18   :  { %392 = vmatpush.msra.mxu3 %v292_v8  ;;  %297 = vmatpush.msra.mxu0 %v257_v9  ;;  %v287_v14 = vld [vmem:[#allocation9 + $0x1c0] sm:$0xff]  ;;  %v256_v15 = vld [vmem:[#allocation9 + $0xc8] sm:$0xff]  ;;  %v253_v17 = vld [vmem:[#allocation9 + $0xb0] sm:$0xff] }
  0x19   :  { %329 = vmatpush.msra.mxu1 %v289_v10  ;;  %361 = vmatpush.msra.mxu2 %v258_v11  ;;  %v288_v16 = vld [vmem:[#allocation9 + $0x1c8] sm:$0xff]  ;;  %v285_v18 = vld [vmem:[#allocation9 + $0x1b0] sm:$0xff]  ;;  %v254_v19 = vld [vmem:[#allocation9 + $0xb8] sm:$0xff] }
  0x1a   :  { %393 = vmatpush.msra.mxu3 %v290_v12  ;;  %298 = vmatpush.msra.mxu0 %v255_v13  ;;  %v286_v20 = vld [vmem:[#allocation9 + $0x1b8] sm:$0xff]  ;;  %v251_v22 = vld [vmem:[#allocation9 + $0xa0] sm:$0xff]  ;;  %v252_v24 = vld [vmem:[#allocation9 + $0xa8] sm:$0xff] }
  0x1b   :  { %330 = vmatpush.msra.mxu1 %v287_v14  ;;  %362 = vmatpush.msra.mxu2 %v256_v15  ;;  %v718_v21 = vld [vmem:[#allocation8 + $0x8] sm:$0xff]  ;;  %v283_v23 = vld [vmem:[#allocation9 + $0x1a0] sm:$0xff]  ;;  %v284_v25 = vld [vmem:[#allocation9 + $0x1a8] sm:$0xff] }
  0x1c   :  { %394 = vmatpush.msra.mxu3 %v288_v16  ;;  %299 = vmatpush.msra.mxu0 %v253_v17  ;;  %v249_v26 = vld [vmem:[#allocation9 + $0x90] sm:$0xff]  ;;  %v250_v28 = vld [vmem:[#allocation9 + $0x98] sm:$0xff]  ;;  %v247_v30 = vld [vmem:[#allocation9 + $0x80] sm:$0xff] }
  0x1d   :  { %331 = vmatpush.msra.mxu1 %v285_v18  ;;  %363 = vmatpush.msra.mxu2 %v254_v19  ;;  %v281_v27 = vld [vmem:[#allocation9 + $0x190] sm:$0xff]  ;;  %v282_v29 = vld [vmem:[#allocation9 + $0x198] sm:$0xff]  ;;  %v279_v31 = vld [vmem:[#allocation9 + $0x180] sm:$0xff] }
  0x1e   :  { %395 = vmatpush.msra.mxu3 %v286_v20  ;;  %109 = vrot.lane.b32.xlu1 %v718_v21, %s671_s8  ;;  %v248_v32 = vld [vmem:[#allocation9 + $0x88] sm:$0xff]  ;;  %v245_v34 = vld [vmem:[#allocation9 + $0x70] sm:$0xff]  ;;  %v246_v36 = vld [vmem:[#allocation9 + $0x78] sm:$0xff] }
  0x1f   :  { %139 = vrot.lane.b32.xlu0 %v714_v4, %s672_s2  ;;  %300 = vmatpush.msra.mxu0 %v251_v22  ;;  %v280_v33 = vld [vmem:[#allocation9 + $0x188] sm:$0xff]  ;;  %v277_v35 = vld [vmem:[#allocation9 + $0x170] sm:$0xff]  ;;  %v278_v37 = vld [vmem:[#allocation9 + $0x178] sm:$0xff] }
  0x20   :  { %332 = vmatpush.msra.mxu1 %v283_v23  ;;  %364 = vmatpush.msra.mxu2 %v252_v24  ;;  %v243_v38 = vld [vmem:[#allocation9 + $0x60] sm:$0xff]  ;;  %v244_v40 = vld [vmem:[#allocation9 + $0x68] sm:$0xff]  ;;  %v241_v42 = vld [vmem:[#allocation9 + $0x50] sm:$0xff] }
  0x21   :  { %396 = vmatpush.msra.mxu3 %v284_v25  ;;  %301 = vmatpush.msra.mxu0 %v249_v26  ;;  %v275_v39 = vld [vmem:[#allocation9 + $0x160] sm:$0xff]  ;;  %v276_v41 = vld [vmem:[#allocation9 + $0x168] sm:$0xff]  ;;  %v273_v43 = vld [vmem:[#allocation9 + $0x150] sm:$0xff] }
  0x22   :  { %333 = vmatpush.msra.mxu1 %v281_v27  ;;  %365 = vmatpush.msra.mxu2 %v250_v28  ;;  %v242_v44 = vld [vmem:[#allocation9 + $0x58] sm:$0xff]  ;;  %v239_v46 = vld [vmem:[#allocation9 + $0x40] sm:$0xff]  ;;  %v240_v48 = vld [vmem:[#allocation9 + $0x48] sm:$0xff] }
  0x23   :  { %397 = vmatpush.msra.mxu3 %v282_v29  ;;  %302 = vmatpush.msra.mxu0 %v247_v30  ;;  %v274_v45 = vld [vmem:[#allocation9 + $0x158] sm:$0xff]  ;;  %v271_v47 = vld [vmem:[#allocation9 + $0x140] sm:$0xff]  ;;  %v272_v49 = vld [vmem:[#allocation9 + $0x148] sm:$0xff] }
  0x24   :  { %334 = vmatpush.msra.mxu1 %v279_v31  ;;  %366 = vmatpush.msra.mxu2 %v248_v32  ;;  %v237_v50 = vld [vmem:[#allocation9 + $0x30] sm:$0xff]  ;;  %v238_v52 = vld [vmem:[#allocation9 + $0x38] sm:$0xff]  ;;  %v235_v54 = vld [vmem:[#allocation9 + $0x20] sm:$0xff] }
  0x25   :  { %398 = vmatpush.msra.mxu3 %v280_v33  ;;  %303 = vmatpush.msra.mxu0 %v245_v34  ;;  %v269_v51 = vld [vmem:[#allocation9 + $0x130] sm:$0xff]  ;;  %v270_v53 = vld [vmem:[#allocation9 + $0x138] sm:$0xff]  ;;  %v267_v55 = vld [vmem:[#allocation9 + $0x120] sm:$0xff] }
  0x26   :  { %335 = vmatpush.msra.mxu1 %v277_v35  ;;  %367 = vmatpush.msra.mxu2 %v246_v36  ;;  %v236_v56 = vld [vmem:[#allocation9 + $0x28] sm:$0xff]  ;;  %v233_v58 = vld [vmem:[#allocation9 + $0x10] sm:$0xff]  ;;  %v234_v60 = vld [vmem:[#allocation9 + $0x18] sm:$0xff] }
  0x27   :  { %399 = vmatpush.msra.mxu3 %v278_v37  ;;  %141 = vrot.lane.b32.xlu0 %v718_v21, %s672_s2  ;;  %v268_v57 = vld [vmem:[#allocation9 + $0x128] sm:$0xff]  ;;  %v265_v59 = vld [vmem:[#allocation9 + $0x110] sm:$0xff]  ;;  %v266_v61 = vld [vmem:[#allocation9 + $0x118] sm:$0xff] }
  0x28   :  { %304 = vmatpush.msra.mxu0 %v243_v38  ;;  %336 = vmatpush.msra.mxu1 %v275_v39  ;;  %v231_v62 = vld [vmem:[#allocation9] sm:$0xff]  ;;  %v232_v0 = vld [vmem:[#allocation9 + $0x8] sm:$0xff]  ;;  %v726_v2 = vld [vmem:[#allocation3] sm:$0xff] }
  0x29   :  { %368 = vmatpush.msra.mxu2 %v244_v40  ;;  %400 = vmatpush.msra.mxu3 %v276_v41  ;;  %v263_v63 = vld [vmem:[#allocation9 + $0x100] sm:$0xff]  ;;  %v264_v1 = vld [vmem:[#allocation9 + $0x108] sm:$0xff]  ;;  %v728_v3 = vld [vmem:[#allocation3 + $0x8] sm:$0xff]  ;;  %v209_v7 = vmul.f32 %v726_v2, %v726_v2 }
  0x2a   :  { %305 = vmatpush.msra.mxu0 %v241_v42  ;;  %337 = vmatpush.msra.mxu1 %v273_v43  ;;  %v734_v5 = vld [vmem:[#allocation6] sm:$0xff]  ;;  %v736_v6 = vld [vmem:[#allocation6 + $0x8] sm:$0xff]  ;;  %v210_v8 = vmul.f32 %v728_v3, %v728_v3 }
  0x2b   :  { %369 = vmatpush.msra.mxu2 %v242_v44  ;;  %401 = vmatpush.msra.mxu3 %v274_v45  ;;  %v213_v9 = vmul.f32 %v734_v5, %v734_v5  ;;  %v214_v10 = vmul.f32 %v736_v6, %v736_v6  ;;  %v217_v11 = vmul.f32 %v734_v5, %v726_v2 }
  0x2c   :  { %306 = vmatpush.msra.mxu0 %v239_v46  ;;  %338 = vmatpush.msra.mxu1 %v271_v47  ;;  %v218_v12 = vmul.f32 %v736_v6, %v728_v3 }
  0x2d   :  { %370 = vmatpush.msra.mxu2 %v240_v48  ;;  %402 = vmatpush.msra.mxu3 %v272_v49  ;;  %v81_v48 = vsub.f32 %v726_v2, %v734_v5  ;;  %v82_v49 = vsub.f32 %v728_v3, %v736_v6 }
  0x2e   :  { %307 = vmatpush.msra.mxu0 %v237_v50  ;;  %339 = vmatpush.msra.mxu1 %v269_v51 }
  0x2f   :  { %371 = vmatpush.msra.mxu2 %v238_v52  ;;  %403 = vmatpush.msra.mxu3 %v270_v53  ;;  %v83_v51 = vand.u32 2147483647, %v81_v48  ;;  %v84_v52 = vand.u32 2147483647, %v82_v49  ;;  %v87_v53 = vmul.f32 0.5, %v81_v48 }
  0x30   :  { %308 = vmatpush.msra.mxu0 %v235_v54  ;;  %340 = vmatpush.msra.mxu1 %v267_v55 }
  0x31   :  { %372 = vmatpush.msra.mxu2 %v236_v56  ;;  %404 = vmatpush.msra.mxu3 %v268_v57  ;;  %v88_v57 = vmul.f32 0.5, %v82_v49  ;;  %vm85_vm2 = vcmp.lt.f32.partialorder %v83_v51, 1.0  ;;  %vm86_vm3 = vcmp.lt.f32.partialorder %v84_v52, 1.0 }
  0x32   :  { %309 = vmatpush.msra.mxu0 %v233_v58  ;;  %341 = vmatpush.msra.mxu1 %v265_v59  ;;  %v89_v59 = vmul.f32 %v87_v53, %v81_v48 }
  0x33   :  { %373 = vmatpush.msra.mxu2 %v234_v60  ;;  %405 = vmatpush.msra.mxu3 %v266_v61  ;;  %v522_v60 = vadd.f32 -0.5, %v83_v51  ;;  %v523_v61 = vadd.f32 -0.5, %v84_v52 }
  0x34   :  { %310 = vmatpush.msra.mxu0 %v231_v62  ;;  %342 = vmatpush.msra.mxu1 %v263_v63  ;;  %v90_v63 = vmul.f32 %v88_v57, %v82_v49 }
  0x35   :  { %374 = vmatpush.msra.mxu2 %v232_v0  ;;  %406 = vmatpush.msra.mxu3 %v264_v1 }
  0x36   :  { %311 = vmatmul.f32.vlgmr.msra.gmra.mxu0 %v726_v2  ;;  %343 = vmatmul.f32.vlgmr.msra.gmra.mxu1 %v728_v3 }
  0x37   :  { %375 = vmatmul.f32.vlgmr.msra.gmra.mxu2 %v726_v2  ;;  %407 = vmatmul.f32.vlgmr.msra.gmra.mxu3 %v728_v3  ;;  %v93_v3 = vsel %vm85_vm2, %v89_v59, %v522_v60 }
  0x3e   :  { %314 = vmatmul.f32.gmra.mxu0 %v734_v5  ;;  %346 = vmatmul.f32.gmra.mxu1 %v736_v6 }
  0x3f   :  { %378 = vmatmul.f32.gmra.mxu2 %v734_v5  ;;  %410 = vmatmul.f32.gmra.mxu3 %v736_v6  ;;  %v94_v6 = vsel %vm86_vm3, %v90_v63, %v523_v61 }
  0x46   :  { %317 = vmatmul.f32.gmra.mxu0 %v209_v7  ;;  %349 = vmatmul.f32.gmra.mxu1 %v210_v8 }
  0x47   :  { %381 = vmatmul.f32.gmra.mxu2 %v209_v7  ;;  %413 = vmatmul.f32.gmra.mxu3 %v210_v8  ;;  %v95_v8 = vadd.f32 %v94_v6, %v93_v3 }
  0x4e   :  { %320 = vmatmul.f32.gmra.mxu0 %v213_v9  ;;  %352 = vmatmul.f32.gmra.mxu1 %v214_v10 }
  0x4f   :  { %384 = vmatmul.f32.gmra.mxu2 %v213_v9  ;;  %416 = vmatmul.f32.gmra.mxu3 %v214_v10 }
  0x56   :  { %323 = vmatmul.f32.gmra.mxu0 %v217_v11  ;;  %355 = vmatmul.f32.gmra.mxu1 %v218_v12 }
  0x57   :  { %387 = vmatmul.f32.gmra.mxu2 %v217_v11  ;;  %419 = vmatmul.f32.gmra.mxu3 %v218_v12 }
  0x88   :  { %v108_v13 = vpop.permute.xlu1 %107 }
  0x89   :  { %v115_v14 = vsub.f32 %v714_v4, %v108_v13 }
  0x8b   :  { %v117_v15 = vmul.f32 %v115_v14, %v115_v14 }
  0x8d   :  { %121 = vrot.lane.b32.xlu0 %v117_v15, %s673_s3 }
  0x90   :  { %v110_v16 = vpop.permute.xlu1 %109 }
  0x91   :  { %v112_v17 = vsel %vm111_vm0, %v108_v13, %v110_v16  ;;  %v140_v18 = vpop.permute.xlu0 %139  ;;  %vm501_vm0 = vcmask 0  }
  0x92   :  { %v116_v19 = vsub.f32 %v718_v21, %v112_v17  ;;  %v147_v20 = vsub.f32 %v714_v4, %v140_v18 }
  0x94   :  { %v118_v22 = vmul.f32 %v116_v19, %v116_v19  ;;  %180 = vrot.lane.b32.xlu2 %v147_v20, %s674_s9 }
  0x96   :  { %123 = vrot.lane.b32.xlu1 %v118_v22, %s673_s3 }
  0x99   :  { %v142_v23 = vpop.permute.xlu0 %141 }
  0x9a   :  { %v144_v24 = vsel %vm143_vm1, %v140_v18, %v142_v23 }
  0x9b   :  { %v148_v25 = vsub.f32 %v718_v21, %v144_v24 }
  0x9d   :  { %182 = vrot.lane.b32.xlu2 %v148_v25, %s674_s9 }
  0xb3   :  { %v312_v26 = vpop.f32.mrf.mxu0  ;;  %v344_v27 = vpop.f32.mrf.mxu1 }
  0xb4   :  { %v345_v35 = vadd.f32 %v344_v27, %v312_v26 }
  0xb6   :  { %v423_v37 = vmul.f32 %v345_v35, %v345_v35 }
  0xb7   :  { %96 = vadd.xlane.f32.xlu0 %v95_v8 }
  0xba   :  { %v376_v28 = vpop.f32.mrf.mxu2  ;;  %v408_v29 = vpop.f32.mrf.mxu3 }
  0xbb   :  { %v315_v30 = vpop.f32.mrf.mxu0  ;;  %v347_v31 = vpop.f32.mrf.mxu1  ;;  %v409_v42 = vadd.f32 %v408_v29, %v376_v28 }
  0xbc   :  { %v348_v36 = vadd.f32 %v347_v31, %v315_v30 }
  0xbd   :  { %v424_v54 = vmul.f32 %v409_v42, %v409_v42 }
  0xbe   :  { %v425_v39 = vmul.f32 %v348_v36, %v348_v36  ;;  %v427_v24 = vmul.f32 %v348_v36, %v345_v35 }
  0xc0   :  { %v445_v21 = vadd.f32 %v425_v39, %v423_v37 }
  0xc2   :  { %v379_v32 = vpop.f32.mrf.mxu2  ;;  %v411_v33 = vpop.f32.mrf.mxu3  ;;  %v447_v55 = vadd.f32 0.0001, %v445_v21 }
  0xc3   :  { %v318_v34 = vpop.f32.mrf.mxu0  ;;  %v350_v4 = vpop.f32.mrf.mxu1  ;;  %v412_v43 = vadd.f32 %v411_v33, %v379_v32 }
  0xc4   :  { %v351_v38 = vadd.f32 %v350_v4, %v318_v34 }
  0xc5   :  { %v426_v56 = vmul.f32 %v412_v43, %v412_v43  ;;  %v428_v26 = vmul.f32 %v412_v43, %v409_v42 }
  0xc6   :  { %v429_v46 = vsub.f32 %v351_v38, %v423_v37  ;;  %v435_v37 = vmul.f32 2.0, %v427_v24 }
  0xc7   :  { %v446_v9 = vadd.f32 %v426_v56, %v424_v54 }
  0xc9   :  { %v448_v15 = vadd.f32 0.0001, %v446_v9 }
  0xca   :  { %v382_v40 = vpop.f32.mrf.mxu2  ;;  %v414_v41 = vpop.f32.mrf.mxu3 }
  0xcb   :  { %v321_v44 = vpop.f32.mrf.mxu0  ;;  %v353_v45 = vpop.f32.mrf.mxu1  ;;  %v415_v62 = vadd.f32 %v414_v41, %v382_v40  ;;  %v436_v40 = vmul.f32 2.0, %v428_v26 }
  0xcc   :  { %v354_v47 = vadd.f32 %v353_v45, %v321_v44 }
  0xcd   :  { %v430_v10 = vsub.f32 %v415_v62, %v424_v54  ;;  %v438_v49 = vadd.f32 0.0001, %v436_v40 }
  0xce   :  { %v431_v50 = vsub.f32 %v354_v47, %v425_v39  ;;  %v149_v39 = vlaneseq }
  0xd0   :  { %v449_v58 = vadd.f32 %v431_v50, %v429_v46  ;;  %v437_v46 = vadd.f32 0.0001, %v435_v37  ;;  %v150_v48 = vand.u32 127, %v149_v39 }
  0xd2   :  { %v451_v0 = vadd.f32 0.0009, %v449_v58  ;;  %v385_v1 = vpop.f32.mrf.mxu2  ;;  %v417_v2 = vpop.f32.mrf.mxu3  ;;  %v151_v57 = vadd.s32 128, %v150_v48  ;;  %v156_v63 = vand.u32 15, %v150_v48 }
  0xd3   :  { %v418_v5 = vadd.f32 %v417_v2, %v385_v1  ;;  %v324_v13 = vpop.f32.mrf.mxu0  ;;  %v356_v14 = vpop.f32.mrf.mxu1 }
  0xd4   :  { %v453_v7 = vmul.f32 %v451_v0, %v447_v55  ;;  %v357_v20 = vadd.f32 %v356_v14, %v324_v13  ;;  %v163_v62 = vand.u32 15, %v151_v57  ;;  %vm176_vm14 = vcmp.ne.s32.totalorder %v156_v63, 15 }
  0xd5   :  { %v432_v11 = vsub.f32 %v418_v5, %v426_v56 }
  0xd6   :  { %534 = vrcp.f32 %v453_v7  ;;  %v433_v27 = vsub.f32 %v357_v20, %v427_v24  ;;  %v466_v38 = vand.u32 2147483648, %v453_v7  ;;  %vm460_vm5 = vweird.f32 %v453_v7 }
  0xd7   :  { %v450_v12 = vadd.f32 %v432_v11, %v430_v10  ;;  %v464_v41 = vand.u32 2147483647, %v453_v7  ;;  %vm177_vm12 = vcmp.ne.s32.totalorder %v163_v62, 15 }
  0xd8   :  { %v439_v32 = vmul.f32 2.0, %v433_v27  ;;  %v467_v47 = vor.u32 1.1754944e-38, %v466_v38 }
  0xd9   :  { %v452_v16 = vadd.f32 0.0009, %v450_v12  ;;  %vm465_vm8 = vcmp.eq.f32.partialorder %v464_v41, 8.507059e+37 }
  0xda   :  { %v388_v17 = vpop.f32.mrf.mxu2  ;;  %v420_v18 = vpop.f32.mrf.mxu3  ;;  %v441_v36 = vadd.f32 0.0009, %v439_v32 }
  0xdb   :  { %v454_v19 = vmul.f32 %v452_v16, %v448_v15  ;;  %v421_v23 = vadd.f32 %v420_v18, %v388_v17 }
  0xdc   :  { %v535_v22 = vpop.eup %534  ;;  %v443_v53 = vmul.f32 %v441_v36, %v437_v46 }
  0xdd   :  { %536 = vrcp.f32 %v454_v19  ;;  %v456_v25 = vmul.f32 %v535_v22, %v453_v7  ;;  %v434_v29 = vsub.f32 %v421_v23, %v428_v26  ;;  %vm461_vm4 = vweird.f32 %v535_v22 }
  0xde   :  { %vm462_vm6 = vmor %vm460_vm5, %vm461_vm4  ;;  %v479_v42 = vand.u32 2147483647, %v454_v19  ;;  %v481_v21 = vand.u32 2147483648, %v454_v19  ;;  %vm475_vm9 = vweird.f32 %v454_v19 }
  0xdf   :  { %v457_v28 = vsub.f32 1.0, %v456_v25  ;;  %v440_v33 = vmul.f32 2.0, %v434_v29 }
  0xe0   :  { %v482_v52 = vor.u32 1.1754944e-38, %v481_v21  ;;  %vm480_vm11 = vcmp.eq.f32.partialorder %v479_v42, 8.507059e+37 }
  0xe1   :  { %v458_v30 = vmul.f32 %v535_v22, %v457_v28  ;;  %v442_v43 = vadd.f32 0.0009, %v440_v33 }
  0xe3   :  { %v537_v31 = vpop.eup %536  ;;  %v459_v34 = vadd.f32 %v535_v22, %v458_v30  ;;  %v444_v54 = vmul.f32 %v442_v43, %v438_v49 }
  0xe4   :  { %v471_v4 = vmul.f32 %v537_v31, %v454_v19  ;;  %vm476_vm7 = vweird.f32 %v537_v31 }
  0xe5   :  { %v463_v44 = vsel %vm462_vm6, %v535_v22, %v459_v34  ;;  %vm477_vm10 = vmor %vm475_vm9, %vm476_vm7 }
  0xe6   :  { %v472_v35 = vsub.f32 1.0, %v471_v4  ;;  %v468_v51 = vsel %vm465_vm8, %v467_v47, %v463_v44 }
  0xe7   :  { %v469_v59 = vmul.f32 %v468_v51, %v443_v53 }
  0xe8   :  { %v473_v45 = vmul.f32 %v537_v31, %v472_v35 }
  0xea   :  { %v474_v50 = vadd.f32 %v537_v31, %v473_v45 }
  0xec   :  { %v478_v55 = vsel %vm477_vm10, %v537_v31, %v474_v50 }
  0xed   :  { %v483_v56 = vsel %vm480_vm11, %v482_v52, %v478_v55 }
  0xee   :  { %v181_v58 = vpop.permute.xlu2 %180  ;;  %v484_v60 = vmul.f32 %v483_v56, %v444_v54 }
  0xf0   :  { %v485_v61 = vadd.f32 %v484_v60, %v469_v59 }
  0xf2   :  { %486 = vadd.xlane.f32.xlu2 %v485_v61 }
  0xf7   :  { %v183_v0 = vpop.permute.xlu2 %182 }
  0xf8   :  { %v185_v1 = vsel %vm184_vm13, %v181_v58, %v183_v0  ;;  %v189_v2 = vsel %vm177_vm12, %v183_v0, 0.0 }
  0xf9   :  { %v188_v3 = vsel %vm176_vm14, %v185_v1, 0.0  ;;  %v191_v5 = vmul.f32 %v189_v2, %v189_v2 }
  0xfa   :  { %v190_v6 = vmul.f32 %v188_v3, %v188_v3 }
  0xfb   :  { %v192_v7 = vsel %vm184_vm13, %v191_v5, 0.0 }
  0xfc   :  { %v193_v8 = vadd.f32 %v192_v7, %v190_v6 }
  0xfe   :  { %194 = vadd.xlane.f32.xlu2 %v193_v8 }
  0xff   :  { %v122_v9 = vpop.permute.xlu0 %121 }
 0x108   :  { %v124_v10 = vpop.permute.xlu1 %123 }
 0x109   :  { %v126_v11 = vsel %vm125_vm15, %v122_v9, %v124_v10  ;;  %v129_v12 = vsel %vm125_vm15, %v124_v10, 0.0 }
 0x10a   :  { %v130_v13 = vadd.f32 %v129_v12, %v126_v11 }
 0x10c   :  { %131 = vadd.xlane.f32.xlu1 %v130_v13 }
 0x12a   :  { %v97_v16 = vpop.xlane.xlu0 %96 }
 0x12b   :  { %v98_v17 = vrot.slane %v97_v16, 4 }
 0x12d   :  { %v99_v20 = vadd.f32 %v98_v17, %v97_v16 }
 0x12f   :  { %v100_v24 = vrot.slane %v99_v20, 2 }
 0x131   :  { %v101_v27 = vadd.f32 %v100_v24, %v99_v20 }
 0x133   :  { %v102_v30 = vrot.slane %v101_v27, 1 }
 0x135   :  { %v103_v37 = vadd.f32 %v102_v30, %v101_v27 }
 0x137   :  { %v104_v35 = vmul.f32 0.00048828125, %v103_v37 }
 0x139   :  { %v495_v44 = vmul.f32 0.65, %v104_v35 }
 0x165   :  { %v487_v14 = vpop.xlane.xlu2 %486 }
 0x166   :  { %v488_v15 = vrot.slane %v487_v14, 4 }
 0x168   :  { %v489_v18 = vadd.f32 %v488_v15, %v487_v14 }
 0x16a   :  { %v490_v22 = vrot.slane %v489_v18, 2 }
 0x16c   :  { %v491_v25 = vadd.f32 %v490_v22, %v489_v18 }
 0x16e   :  { %v492_v28 = vrot.slane %v491_v25, 1 }
 0x170   :  { %v493_v32 = vadd.f32 %v492_v28, %v491_v25 }
 0x171   :  { %v195_v19 = vpop.xlane.xlu2 %194 }
 0x172   :  { %v196_v23 = vrot.slane %v195_v19, 4  ;;  %v494_v38 = vmul.f32 0.00048828125, %v493_v32 }
 0x174   :  { %v197_v26 = vadd.f32 %v196_v23, %v195_v19  ;;  %v496_v36 = vsub.f32 1.0, %v494_v38 }
 0x176   :  { %v198_v29 = vrot.slane %v197_v26, 2  ;;  %v497_v45 = vmul.f32 0.35, %v496_v36 }
 0x178   :  { %v199_v33 = vadd.f32 %v198_v29, %v197_v26  ;;  %v498_v49 = vadd.f32 %v497_v45, %v495_v44 }
 0x17a   :  { %v200_v39 = vrot.slane %v199_v33, 1 }
 0x17c   :  { %v201_v42 = vadd.f32 %v200_v39, %v199_v33 }
 0x17e   :  { %v203_v46 = vmul.f32 0.0010416667, %v201_v42 }
 0x17f   :  { %v132_v31 = vpop.xlane.xlu1 %131 }
 0x180   :  { %v133_v34 = vrot.slane %v132_v31, 4 }
 0x182   :  { %v134_v4 = vadd.f32 %v133_v34, %v132_v31 }
 0x184   :  { %v135_v40 = vrot.slane %v134_v4, 2 }
 0x186   :  { %v136_v41 = vadd.f32 %v135_v40, %v134_v4 }
 0x188   :  { %v137_v21 = vrot.slane %v136_v41, 1 }
 0x18a   :  { %v138_v43 = vadd.f32 %v137_v21, %v136_v41 }
 0x18c   :  { %v202_v47 = vmul.f32 0.0010416667, %v138_v43 }
 0x18e   :  { %v204_v48 = vadd.f32 %v203_v46, %v202_v47 }
 0x190   :  { %v499_v50 = vmul.f32 0.05, %v204_v48 }
 0x192   :  { %v500_v51 = vadd.f32 %v499_v50, %v498_v49 }
 0x194   :  { %502 = vst.msk [vmem:[#allocation11] sm:$0x1] %vm501_vm0, %v500_v51 }
 0x195   :  { %513 = dma.vmem_to_hbm [thread:$0]  %s509_s11, 16, %s511_s14, [#allocation5]  }
 0x196   :  { %664 = dma.done.wait [#allocation5], 16  }
 0x197   :  { %665 = vsyncadd [#allocation5], 4294967280 }
 0x198   :  { %518 = vsyncpa [#allocation4], 1 }
 0x199   :  { %519 = vsyncpa [#allocation7], 1 }
 0x19a   :  { %520 = vsyncpa [#allocation10], 1 }
 0x19b   :  { %521 = vsyncpa [#allocation5], 1 }

</bundles_post_ra>
